<compile_context>
chip_gen: v7x
topology: tpu7x:2x2x1
jax: 0.10.0
libtpu: 0.0.40
codegen_flags: <defaults>
</compile_context>

<pallas_src>
import functools

import jax
import jax.numpy as jnp
from jax.experimental import pallas as pl
from jax.experimental.pallas import tpu as pltpu


def _inner_product_decoder_kernel(zr_ref, zc_ref, out_ref, acc_ref):
    """One (tile_n, tile_n) output tile of sigmoid(z @ z.T), reduced over K."""
    k = pl.program_id(2)

    @pl.when(k == 0)
    def _init():
        acc_ref[...] = jnp.zeros_like(acc_ref)

    # zr_ref: [tile_n, tile_k] (rows i), zc_ref: [tile_n, tile_k] (rows j).
    # Contract the feature (last) dims => zr @ zc.T on the MXU, f32 accumulate.
    acc_ref[...] += jax.lax.dot_general(
        zr_ref[...], zc_ref[...],
        dimension_numbers=(((1,), (1,)), ((), ())),
        preferred_element_type=jnp.float32)

    @pl.when(k == pl.num_programs(2) - 1)
    def _finalize():
        acc = acc_ref[...]
        # Exact f32 sigmoid (approx reciprocal would eat into the 1e-5 tol).
        out_ref[...] = (1.0 / (1.0 + jnp.exp(-acc))).astype(out_ref.dtype)


@functools.partial(jax.jit, static_argnames=("dropout", "training", "tile_n",
                                             "tile_k", "use_bf16"))
def inner_product_decoder(z, *, dropout=0.0, training=False, rng_key=None,
                          tile_n=128, tile_k=128, use_bf16=False):
    """sigmoid(dropout(z) @ dropout(z).T) via a tiled Pallas TPU kernel.

    z: [N, D] float array of node embeddings.  Returns [N, N] float32.
    """
    z = jnp.asarray(z, jnp.float32)
    N, D = z.shape

    # Dropout (training-mode only).  Kept in the JAX wrapper so the same
    # dropped z is seen by both matmul operands.
    # TODO(synk): mask RNG is JAX's, not torch's, so training-mode bit patterns
    # differ from PyTorch (inference/eval path is exact).
    if training and dropout > 0.0:
        if rng_key is None:
            rng_key = jax.random.PRNGKey(0)
        keep = 1.0 - dropout
        mask = jax.random.bernoulli(rng_key, keep, z.shape)
        z = jnp.where(mask, z / keep, 0.0)

    # Lane-dense padding: pad N and D up to tile multiples (>=128).  Zero
    # feature columns leave z @ z.T unchanged; padded rows are sliced off
    # after the call.
    n_pad = pl.cdiv(N, tile_n) * tile_n
    d_pad = pl.cdiv(D, tile_k) * tile_k
    zp = jnp.zeros((n_pad, d_pad), jnp.float32).at[:N, :D].set(z)

    mm_dtype = jnp.bfloat16 if use_bf16 else jnp.float32
    zmm = zp.astype(mm_dtype)

    grid = (n_pad // tile_n, n_pad // tile_n, d_pad // tile_k)

    adj_pad = pl.pallas_call(
        _inner_product_decoder_kernel,
        out_shape=jax.ShapeDtypeStruct((n_pad, n_pad), jnp.float32),
        grid_spec=pltpu.PrefetchScalarGridSpec(
            num_scalar_prefetch=0,
            grid=grid,
            in_specs=[
                pl.BlockSpec((tile_n, tile_k), lambda i, j, k: (i, k)),  # rows
                pl.BlockSpec((tile_n, tile_k), lambda i, j, k: (j, k)),  # cols
            ],
            out_specs=pl.BlockSpec((tile_n, tile_n), lambda i, j, k: (i, j)),
            scratch_shapes=[pltpu.VMEM((tile_n, tile_n), jnp.float32)],
        ),
        compiler_params=pltpu.CompilerParams(
            dimension_semantics=("parallel", "parallel", "arbitrary")),
    )(zmm, zmm)

    return adj_pad[:N, :N]


def inner_product_decoder_ref(z, *, dropout=0.0, training=False, rng_key=None):
    """Pure-JAX reference (eval-mode matches PyTorch exactly)."""
    z = jnp.asarray(z, jnp.float32)
    if training and dropout > 0.0:
        if rng_key is None:
            rng_key = jax.random.PRNGKey(0)
        keep = 1.0 - dropout
        mask = jax.random.bernoulli(rng_key, keep, z.shape)
        z = jnp.where(mask, z / keep, 0.0)
    return jax.nn.sigmoid(z @ z.T)


if __name__ == "__main__":
    # Small, padding-exercising shape: 200 nodes x 48 latent dims
    # (pads to 256 x 128 internally -> 2x2x1 grid of 128-wide tiles).
    N, D = 200, 48
    key = jax.random.PRNGKey(0)
    z = jax.random.normal(key, (N, D), jnp.float32)

    adj = jax.block_until_ready(inner_product_decoder(z))          # eval mode
    ref = jax.block_until_ready(inner_product_decoder_ref(z))

    assert adj.shape == (N, N)
    assert jnp.allclose(adj, ref, atol=1e-5, rtol=1e-5), float(
        jnp.max(jnp.abs(adj - ref)))
    print("KERNEL_OK")
</pallas_src>

<mosaic_0001>
module attributes {stable_mosaic.version = 11 : i64} {
  func.func @_inner_product_decoder_kernel(%arg0: i32, %arg1: i32, %arg2: i32, %arg3: memref<128x128xf32, #tpu.memory_space<vmem>>, %arg4: memref<128x128xf32, #tpu.memory_space<vmem>>, %arg5: memref<128x128xf32, #tpu.memory_space<vmem>>, %arg6: memref<128x128xf32, #tpu.memory_space<vmem>>) attributes {dimension_semantics = [#tpu.dimension_semantics<parallel>, #tpu.dimension_semantics<parallel>, #tpu.dimension_semantics<arbitrary>], iteration_bounds = array<i64: 2, 2, 1>, scalar_prefetch = 0 : i64, scratch_operands = 1 : i64, tpu.core_type = #tpu.core_type<tc>, window_params = [{transform_indices = @transform_0, window_bounds = array<i64: 128, 128>}, {transform_indices = @transform_1, window_bounds = array<i64: 128, 128>}, {transform_indices = @transform_2, window_bounds = array<i64: 128, 128>}]} {
    %c0_i32 = arith.constant 0 : i32
    %0 = arith.cmpi eq, %arg2, %c0_i32 : i32
    %1 = arith.extui %0 : i1 to i32
    %c0_i32_0 = arith.constant 0 : i32
    %2 = arith.cmpi ne, %1, %c0_i32_0 : i32
    scf.if %2 {
      %cst_10 = arith.constant 0.000000e+00 : f32
      %12 = vector.broadcast %cst_10 : f32 to vector<128x128xf32>
      %c0_11 = arith.constant 0 : index
      %c0_12 = arith.constant 0 : index
      %13 = vector.load %arg6[%c0_11, %c0_12] : memref<128x128xf32, #tpu.memory_space<vmem>>, vector<128x128xf32>
      tpu.vector_store %arg6[%c0_11, %c0_12], %12 {strides = array<i32>} : memref<128x128xf32, #tpu.memory_space<vmem>>, vector<128x128xf32>,
    } else {
    }
    %c0 = arith.constant 0 : index
    %c0_1 = arith.constant 0 : index
    %3 = vector.load %arg6[%c0, %c0_1] : memref<128x128xf32, #tpu.memory_space<vmem>>, vector<128x128xf32>
    %c0_2 = arith.constant 0 : index
    %c0_3 = arith.constant 0 : index
    %4 = vector.load %arg3[%c0_2, %c0_3] : memref<128x128xf32, #tpu.memory_space<vmem>>, vector<128x128xf32>
    %c0_4 = arith.constant 0 : index
    %c0_5 = arith.constant 0 : index
    %5 = vector.load %arg4[%c0_4, %c0_5] : memref<128x128xf32, #tpu.memory_space<vmem>>, vector<128x128xf32>
    %cst = arith.constant dense<0.000000e+00> : vector<128x128xf32>
    %6 = tpu.matmul %4, %5, %cst {dimension_numbers = #tpu.dot_dimension_numbers<[1], [1], [0], [0], [0, 0, 1, 0], [], []>} : vector<128x128xf32>, vector<128x128xf32>, vector<128x128xf32> -> vector<128x128xf32>
    %7 = arith.addf %3, %6 : vector<128x128xf32>
    %c0_6 = arith.constant 0 : index
    %c0_7 = arith.constant 0 : index
    %8 = vector.load %arg6[%c0_6, %c0_7] : memref<128x128xf32, #tpu.memory_space<vmem>>, vector<128x128xf32>
    tpu.vector_store %arg6[%c0_6, %c0_7], %7 {strides = array<i32>} : memref<128x128xf32, #tpu.memory_space<vmem>>, vector<128x128xf32>,
    %c0_i32_8 = arith.constant 0 : i32
    %9 = arith.cmpi eq, %arg2, %c0_i32_8 : i32
    %10 = arith.extui %9 : i1 to i32
    %c0_i32_9 = arith.constant 0 : i32
    %11 = arith.cmpi ne, %10, %c0_i32_9 : i32
    scf.if %11 {
      %c0_10 = arith.constant 0 : index
      %c0_11 = arith.constant 0 : index
      %12 = vector.load %arg6[%c0_10, %c0_11] : memref<128x128xf32, #tpu.memory_space<vmem>>, vector<128x128xf32>
      %cst_12 = arith.constant 0.000000e+00 : f32
      %13 = vector.broadcast %cst_12 : f32 to vector<128x128xf32>
      %14 = arith.subf %13, %12 : vector<128x128xf32>
      %15 = math.exp %14 : vector<128x128xf32>
      %cst_13 = arith.constant 1.000000e+00 : f32
      %16 = vector.broadcast %cst_13 : f32 to vector<128x128xf32>
      %17 = arith.addf %16, %15 : vector<128x128xf32>
      %cst_14 = arith.constant 1.000000e+00 : f32
      %18 = vector.broadcast %cst_14 : f32 to vector<128x128xf32>
      %19 = arith.divf %18, %17 : vector<128x128xf32>
      %c0_15 = arith.constant 0 : index
      %c0_16 = arith.constant 0 : index
      %20 = vector.load %arg5[%c0_15, %c0_16] : memref<128x128xf32, #tpu.memory_space<vmem>>, vector<128x128xf32>
      tpu.vector_store %arg5[%c0_15, %c0_16], %19 {strides = array<i32>} : memref<128x128xf32, #tpu.memory_space<vmem>>, vector<128x128xf32>,
    } else {
    }
    return
  }
  func.func @transform_0(%arg0: i32, %arg1: i32, %arg2: i32) -> (i32, i32) {
    %c0_i32 = arith.constant 0 : i32
    return %arg0, %arg2 : i32, i32
  }
  func.func @transform_1(%arg0: i32, %arg1: i32, %arg2: i32) -> (i32, i32) {
    %c0_i32 = arith.constant 0 : i32
    return %arg1, %arg2 : i32, i32
  }
  func.func @transform_2(%arg0: i32, %arg1: i32, %arg2: i32) -> (i32, i32) {
    %c0_i32 = arith.constant 0 : i32
    return %arg0, %arg1 : i32, i32
  }
}

</mosaic_0001>

<bundles_post_ra>
// kernel: inner_product_decoder.1
= control target key start
LH: loop header
LB: loop body
LE: loop exit
PB: predicated region body
PF: predicated region fallthrough
CT: control target
= control target key end

     0   :  { %s1115_s9 = smov 0   ;;  %s1117_s10 = smov 0   ;;  %s1281_s0 = inlined_call_operand.vmem [shape: f32[256,128], index: 0, kind: input, shape index: {}, may-alias: {0,1}]   ;;  %s1282_s1 = inlined_call_operand.vmem [shape: f32[256,128], index: 1, kind: input, shape index: {}, may-alias: {0,1}]   ;;  %s1283_s2 = inlined_call_operand.vmem [shape: f32[256,256], index: 2, kind: output, shape index: {}]  }
   0x1   :  { %s1119_s11 = smov 0   ;;  %s1121_s12 = smov 0  }
   0x2   :  { %s1123_s13 = smov 0   ;;  %s1125_s14 = smov 0  }
   0x3   :  { %s1127_s15 = smov 0  }
   0x4 LB: > { %s27_s16 = sadd.s32 1, %s1090_s13  ;;  %s31_s17 = sadd.s32 1, %s1094_s14  ;;  %s1098_s15 = sphi %s1127_s15, %s12_s15   ;;  %s1094_s14 = sphi %s1125_s14, %s1290_s14   ;;  %s1090_s13 = sphi %s1123_s13, %s1289_s13   ;;  %s1086_s12 = sphi %s1121_s12, %s1288_s12   ;;  %s1082_s11 = sphi %s1119_s11, %s1287_s11   ;;  %s1078_s10 = sphi %s1117_s10, %s1286_s10   ;;  %s1074_s9 = sphi %s1115_s9, %s1285_s9  }
   0x5   : > { %p29_p0 = scmp.ge.s32.totalorder %s27_s16, 2  ;;  %s771_s18 = sadd.s32 4294967295, %s1098_s15  }
   0x6   : > { %p106_p1 = scmp.ne.s32.totalorder %s1078_s10, %s1074_s9  ;;  %p107_p2 = scmp.eq.s32.totalorder %s771_s18, 3 }
   0x7   : > { %s1292_s16 = smov (%p29_p0, %s27_s16), 0  ;;  %s1294_s17 = smov (!%p29_p0, %s31_s17), %s1094_s14 }
   0x8   : > { %s92_s19 = ssub.s32 %s1090_s13, %s1292_s16  ;;  %p33_p3 = scmp.ge.s32.totalorder %s1294_s17, 2 }
   0x9   : > { %p775_p4 = scmp.ge.s32.totalorder %s1098_s15, 1  ;;  %p1161_p5 = por %p107_p2, %p106_p1 }
   0xa   : > { %p155_p6 = scmp.lt.s32.totalorder %s1098_s15, 5  ;;  %s1296_s17 = smov (%p33_p3, %s1294_s17), 0 }
   0xb   : > { %s91_s21 = ssub.s32 %s1094_s14, %s1296_s17  ;;  %s96_s23 = sadd.s32 1, %s1078_s10 }
   0xc   : > { %p156_p7 = pnand %p775_p4, %p155_p6  ;;  %s93_s22 = sor.u32 %s92_s19, %s91_s21 }
   0xd   : > { %p94_p8 = scmp.eq.s32.totalorder %s93_s22, 0  ;;  %s779_s25 = sshll.u32 (!%p156_p7), %s1082_s11, 4 }
   0xe   : > { %159 = sbr.rel (%p156_p7) target bundleno = 368 (0x170), region = 28  ;;  %s777_s26 = sshll.u32 (!%p156_p7), %s1086_s12, 4 }
   0xf   : > { %s1172_s24 = scalar_select %p94_p8, %s1078_s10, %s96_s23  }
  0x10   : > { %p197_p9 = scmp.lt.s32.totalorder (!%p156_p7), %s779_s25, 31  ;;  %p188_p10 = scmp.lt.s32.totalorder (!%p156_p7), %s777_s26, 31 }
  0x11   : > { %s184_s7 = sand.u32 (!%p156_p7), 1, %s1074_s9  }
  0x12   : > { %s776_s8 = sshll.u32 (!%p156_p7), %s184_s7, 7 }
  0x13   : > { %s1219_s9 = scalar_lea.vmem (!%p156_p7), [#allocation3], %s776_s8 }
  0x15   : > { %s1298_s25 = smov (!%p197_p9, %s779_s25), 31  ;;  %s1300_s26 = smov (!%p188_p10, %s777_s26), 31 }
  0x16   : > { %s780_s27 = sshll.u32 %s1298_s25, 3  ;;  %s778_s3 = sshll.u32 %s1300_s26, 3 }
  0x17   : > { %s1179_s30 = scalar_lea.vmem %s1282_s1, %s780_s27  ;;  %s1188_s6 = scalar_lea.vmem %s1281_s0, %s778_s3 }
  0x18   : > { %v258_v0 = vld [vmem:[%s1179_s30] sm:$0xff]  ;;  %v259_v1 = vld [vmem:[%s1179_s30 + $0x8] sm:$0xff]  ;;  %v260_v2 = vld [vmem:[%s1179_s30 + $0x10] sm:$0xff]  ;;  %s787_s18 = sshll.u32 (%p1161_p5), %s1086_s12, 5 }
  0x19   : > { %v876_v3 = vpack.c.bf16 %v259_v1, %v258_v0  ;;  %v261_v4 = vld [vmem:[%s1179_s30 + $0x18] sm:$0xff]  ;;  %v242_v6 = vld [vmem:[%s1188_s6] sm:$0xff]  ;;  %v263_v9 = vld [vmem:[%s1179_s30 + $0x28] sm:$0xff]  ;;  %s591_s19 = sadd.s32 (%p1161_p5), %s1082_s11, %s787_s18 }
  0x1a   : > { %v880_v5 = vpack.c.bf16 %v261_v4, %v260_v2  ;;  %v250_v7 = vld [vmem:[%s1188_s6 + $0x40] sm:$0xff]  ;;  %852 = vmatprep.mubr.f32.mxu0 %v242_v6  ;;  %v264_v11 = vld [vmem:[%s1179_s30 + $0x30] sm:$0xff]  ;;  %v265_v12 = vld [vmem:[%s1179_s30 + $0x38] sm:$0xff]  ;;  %s784_s20 = sshll.u32 (%p1161_p5), %s591_s19, 3 }
  0x1b   : > { %877 = vmatprep.subr.bf16.mxu0 %v876_v3  ;;  %908 = vmatprep.subr.bf16.mxu1 %v876_v3  ;;  %v262_v8 = vld [vmem:[%s1179_s30 + $0x20] sm:$0xff]  ;;  %v888_v13 = vpack.c.bf16 %v265_v12, %v264_v11  ;;  %v267_v15 = vld [vmem:[%s1179_s30 + $0x48] sm:$0xff]  ;;  %v268_v17 = vld [vmem:[%s1179_s30 + $0x50] sm:$0xff]  ;;  %s593_s23 = scalar_lea.vmem (%p1161_p5), %s1283_s2, %s784_s20 }
  0x1c   : > { %879 = vmatpush3.bf16.xpose.msra.mxu0 %v876_v3  ;;  %916 = vmatpush3.bf16.xpose.msra.mxu1 %v876_v3  ;;  %v884_v10 = vpack.c.bf16 %v263_v9, %v262_v8  ;;  %v266_v14 = vld [vmem:[%s1179_s30 + $0x40] sm:$0xff]  ;;  %v269_v18 = vld [vmem:[%s1179_s30 + $0x58] sm:$0xff]  ;;  %v271_v21 = vld [vmem:[%s1179_s30 + $0x68] sm:$0xff] }
  0x1d   : > { %881 = vmatprep.subr.bf16.mxu0 %v880_v5  ;;  %909 = vmatprep.subr.bf16.mxu1 %v880_v5  ;;  %v892_v16 = vpack.c.bf16 %v267_v15, %v266_v14  ;;  %v896_v19 = vpack.c.bf16 %v269_v18, %v268_v17  ;;  %v270_v20 = vld [vmem:[%s1179_s30 + $0x60] sm:$0xff]  ;;  %v272_v23 = vld [vmem:[%s1179_s30 + $0x70] sm:$0xff]  ;;  %v273_v24 = vld [vmem:[%s1179_s30 + $0x78] sm:$0xff] }
  0x1e   : > { %864 = vmatprep.mubr.f32.mxu1 %v250_v7  ;;  %v900_v22 = vpack.c.bf16 %v271_v21, %v270_v20  ;;  %v904_v25 = vpack.c.bf16 %v273_v24, %v272_v23  ;;  %v243_v26 = vld [vmem:[%s1188_s6 + $0x8] sm:$0xff]  ;;  %v244_v28 = vld [vmem:[%s1188_s6 + $0x10] sm:$0xff]  ;;  %v245_v30 = vld [vmem:[%s1188_s6 + $0x18] sm:$0xff] }
  0x1f   : > { %v251_v27 = vld [vmem:[%s1188_s6 + $0x48] sm:$0xff]  ;;  %v252_v29 = vld [vmem:[%s1188_s6 + $0x50] sm:$0xff]  ;;  %v253_v31 = vld [vmem:[%s1188_s6 + $0x58] sm:$0xff] }
  0x20   : > { %v246_v32 = vld [vmem:[%s1188_s6 + $0x20] sm:$0xff]  ;;  %v247_v34 = vld [vmem:[%s1188_s6 + $0x28] sm:$0xff]  ;;  %v248_v36 = vld [vmem:[%s1188_s6 + $0x30] sm:$0xff] }
  0x21   : > { %v254_v33 = vld [vmem:[%s1188_s6 + $0x60] sm:$0xff]  ;;  %v255_v35 = vld [vmem:[%s1188_s6 + $0x68] sm:$0xff]  ;;  %v256_v37 = vld [vmem:[%s1188_s6 + $0x70] sm:$0xff] }
  0x22   : > { %v249_v38 = vld [vmem:[%s1188_s6 + $0x38] sm:$0xff] }
  0x23   : > { %v257_v39 = vld [vmem:[%s1188_s6 + $0x78] sm:$0xff] }
  0x24   : > { %883 = vmatpush3.bf16.xpose.msra.mxu0 %v880_v5  ;;  %917 = vmatpush3.bf16.xpose.msra.mxu1 %v880_v5 }
  0x25   : > { %885 = vmatprep.subr.bf16.mxu0 %v884_v10  ;;  %910 = vmatprep.subr.bf16.mxu1 %v884_v10 }
  0x2c   : > { %887 = vmatpush3.bf16.xpose.msra.mxu0 %v884_v10  ;;  %918 = vmatpush3.bf16.xpose.msra.mxu1 %v884_v10 }
  0x2d   : > { %889 = vmatprep.subr.bf16.mxu0 %v888_v13  ;;  %911 = vmatprep.subr.bf16.mxu1 %v888_v13 }
  0x34   : > { %891 = vmatpush3.bf16.xpose.msra.mxu0 %v888_v13  ;;  %919 = vmatpush3.bf16.xpose.msra.mxu1 %v888_v13 }
  0x35   : > { %893 = vmatprep.subr.bf16.mxu0 %v892_v16  ;;  %912 = vmatprep.subr.bf16.mxu1 %v892_v16 }
  0x3c   : > { %895 = vmatpush3.bf16.xpose.msra.mxu0 %v892_v16  ;;  %920 = vmatpush3.bf16.xpose.msra.mxu1 %v892_v16 }
  0x3d   : > { %897 = vmatprep.subr.bf16.mxu0 %v896_v19  ;;  %913 = vmatprep.subr.bf16.mxu1 %v896_v19 }
  0x44   : > { %899 = vmatpush3.bf16.xpose.msra.mxu0 %v896_v19  ;;  %921 = vmatpush3.bf16.xpose.msra.mxu1 %v896_v19 }
  0x45   : > { %901 = vmatprep.subr.bf16.mxu0 %v900_v22  ;;  %914 = vmatprep.subr.bf16.mxu1 %v900_v22 }
  0x4c   : > { %903 = vmatpush3.bf16.xpose.msra.mxu0 %v900_v22  ;;  %922 = vmatpush3.bf16.xpose.msra.mxu1 %v900_v22 }
  0x4d   : > { %905 = vmatprep.subr.bf16.mxu0 %v904_v25  ;;  %915 = vmatprep.subr.bf16.mxu1 %v904_v25 }
  0x54   : > { %907 = vmatpush3.bf16.xpose.msra.mxu0 %v904_v25  ;;  %923 = vmatpush3.bf16.xpose.msra.mxu1 %v904_v25 }
  0x5b   : > { %853 = vmatmul.mubr.f32.vlgmr.msra.gmra.mrb[0].mxu0 %v243_v26  ;;  %865 = vmatmul.mubr.f32.vlgmr.msra.gmra.mrb[0].mxu1 %v251_v27 }
  0x5c   : > { %855 = vmatprep.mubr.f32.mxu0 %v244_v28  ;;  %867 = vmatprep.mubr.f32.mxu1 %v252_v29 }
  0x5f   : > { %856 = vmatmul.mubr.f32.gmra.mrb[2].mxu0 %v245_v30  ;;  %868 = vmatmul.mubr.f32.gmra.mrb[2].mxu1 %v253_v31 }
  0x60   : > { %858 = vmatprep.mubr.f32.mxu0 %v246_v32  ;;  %870 = vmatprep.mubr.f32.mxu1 %v254_v33 }
  0x63   : > { %859 = vmatmul.mubr.f32.gmra.mrb[4].mxu0 %v247_v34  ;;  %871 = vmatmul.mubr.f32.gmra.mrb[4].mxu1 %v255_v35 }
  0x64   : > { %861 = vmatprep.mubr.f32.mxu0 %v248_v36  ;;  %873 = vmatprep.mubr.f32.mxu1 %v256_v37 }
  0x67   : > { %862 = vmatmul.mubr.f32.gmra.mrb[6].mxu0 %v249_v38  ;;  %874 = vmatmul.mubr.f32.gmra.mrb[6].mxu1 %v257_v39 }
 0x12e   : > { %v854_v40 = vpop.f32.mrb[0].mxu0  ;;  %v866_v41 = vpop.f32.mrb[0].mxu1 }
 0x12f   : > { %v471_v42 = vsub.f32 0.0, %v854_v40  ;;  %v479_v43 = vsub.f32 0.0, %v866_v41  ;;  %v340_v44 = vpop.f32.mrb[1].mxu0  ;;  %v380_v45 = vpop.f32.mrb[1].mxu1 }
 0x130   : > { %v470_v46 = vsub.f32 0.0, %v340_v44  ;;  %v478_v47 = vsub.f32 0.0, %v380_v45 }
 0x131   : > { %v488_v48 = vmul.f32 1.442695, %v471_v42  ;;  %v504_v49 = vmul.f32 1.442695, %v479_v43 }
 0x132   : > { %v486_v50 = vmul.f32 1.442695, %v470_v46  ;;  %v502_v51 = vmul.f32 1.442695, %v478_v47  ;;  %v857_v52 = vpop.f32.mrb[2].mxu0  ;;  %v869_v53 = vpop.f32.mrb[2].mxu1 }
 0x133   : > { %980 = vpow2.f32 %v488_v48  ;;  %v473_v54 = vsub.f32 0.0, %v857_v52  ;;  %v481_v55 = vsub.f32 0.0, %v869_v53  ;;  %v350_v56 = vpop.f32.mrb[3].mxu0  ;;  %v390_v57 = vpop.f32.mrb[3].mxu1 }
 0x134   : > { %982 = vpow2.f32 %v504_v49  ;;  %v472_v58 = vsub.f32 0.0, %v350_v56  ;;  %v480_v59 = vsub.f32 0.0, %v390_v57 }
 0x135   : > { %984 = vpow2.f32 %v486_v50  ;;  %v492_v60 = vmul.f32 1.442695, %v473_v54  ;;  %v508_v61 = vmul.f32 1.442695, %v481_v55 }
 0x136   : > { %986 = vpow2.f32 %v502_v51  ;;  %v490_v62 = vmul.f32 1.442695, %v472_v58  ;;  %v506_v63 = vmul.f32 1.442695, %v480_v59  ;;  %v860_v0 = vpop.f32.mrb[4].mxu0  ;;  %v872_v1 = vpop.f32.mrb[4].mxu1 }
 0x137   : > { %988 = vpow2.f32 %v492_v60  ;;  %v475_v2 = vsub.f32 0.0, %v860_v0  ;;  %v483_v3 = vsub.f32 0.0, %v872_v1  ;;  %v360_v4 = vpop.f32.mrb[5].mxu0  ;;  %v400_v5 = vpop.f32.mrb[5].mxu1 }
 0x138   : > { %990 = vpow2.f32 %v508_v61  ;;  %v474_v6 = vsub.f32 0.0, %v360_v4  ;;  %v482_v7 = vsub.f32 0.0, %v400_v5 }
 0x139   : > { %992 = vpow2.f32 %v490_v62  ;;  %v496_v8 = vmul.f32 1.442695, %v475_v2  ;;  %v512_v9 = vmul.f32 1.442695, %v483_v3 }
 0x13a   : > { %994 = vpow2.f32 %v506_v63  ;;  %v494_v10 = vmul.f32 1.442695, %v474_v6  ;;  %v510_v11 = vmul.f32 1.442695, %v482_v7  ;;  %v863_v12 = vpop.f32.mrb[6].mxu0  ;;  %v875_v13 = vpop.f32.mrb[6].mxu1 }
 0x13b   : > { %996 = vpow2.f32 %v496_v8  ;;  %v477_v14 = vsub.f32 0.0, %v863_v12  ;;  %v370_v15 = vpop.f32.mrb[7].mxu0  ;;  %v410_v16 = vpop.f32.mrb[7].mxu1  ;;  %v485_v35 = vsub.f32 0.0, %v875_v13 }
 0x13c   : > { %998 = vpow2.f32 %v512_v9  ;;  %v476_v38 = vsub.f32 0.0, %v370_v15  ;;  %v484_v41 = vsub.f32 0.0, %v410_v16 }
 0x13d   : > { %v981_v17 = vpop.eup %980  ;;  %1000 = vpow2.f32 %v494_v10  ;;  %v500_v18 = vmul.f32 1.442695, %v477_v14  ;;  %v516_v46 = vmul.f32 1.442695, %v485_v35 }
 0x13e   : > { %v983_v19 = vpop.eup %982  ;;  %v519_v20 = vadd.f32 1.0, %v981_v17  ;;  %1002 = vpow2.f32 %v510_v11  ;;  %v498_v49 = vmul.f32 1.442695, %v476_v38  ;;  %v514_v51 = vmul.f32 1.442695, %v484_v41 }
 0x13f   : > { %v985_v21 = vpop.eup %984  ;;  %v527_v22 = vadd.f32 1.0, %v983_v19  ;;  %1004 = vpow2.f32 %v500_v18 }
 0x140   : > { %v987_v23 = vpop.eup %986  ;;  %1006 = vrcp.f32 %v519_v20  ;;  %v518_v24 = vadd.f32 1.0, %v985_v21 }
 0x141   : > { %v989_v25 = vpop.eup %988  ;;  %1008 = vrcp.f32 %v527_v22  ;;  %v526_v26 = vadd.f32 1.0, %v987_v23 }
 0x142   : > { %v991_v27 = vpop.eup %990  ;;  %1010 = vrcp.f32 %v518_v24  ;;  %v521_v28 = vadd.f32 1.0, %v989_v25 }
 0x143   : > { %v993_v29 = vpop.eup %992  ;;  %1012 = vrcp.f32 %v526_v26  ;;  %v529_v30 = vadd.f32 1.0, %v991_v27 }
 0x144   : > { %v995_v31 = vpop.eup %994  ;;  %1014 = vrcp.f32 %v521_v28  ;;  %v520_v32 = vadd.f32 1.0, %v993_v29 }
 0x145   : > { %v997_v33 = vpop.eup %996  ;;  %1016 = vrcp.f32 %v529_v30  ;;  %v528_v34 = vadd.f32 1.0, %v995_v31 }
 0x146   : > { %v999_v36 = vpop.eup %998  ;;  %1018 = vrcp.f32 %v520_v32  ;;  %v523_v37 = vadd.f32 1.0, %v997_v33 }
 0x147   : > { %v1001_v39 = vpop.eup %1000  ;;  %1020 = vrcp.f32 %v528_v34  ;;  %v531_v40 = vadd.f32 1.0, %v999_v36 }
 0x148   : > { %v1003_v42 = vpop.eup %1002  ;;  %1022 = vrcp.f32 %v523_v37  ;;  %v522_v43 = vadd.f32 1.0, %v1001_v39 }
 0x149   : > { %v1005_v44 = vpop.eup %1004  ;;  %1024 = vrcp.f32 %v531_v40  ;;  %v530_v45 = vadd.f32 1.0, %v1003_v42 }
 0x14a   : > { %v1007_v47 = vpop.eup %1006  ;;  %1026 = vrcp.f32 %v522_v43  ;;  %v525_v48 = vadd.f32 1.0, %v1005_v44 }
 0x14b   : > { %v1009_v50 = vpop.eup %1008  ;;  %567 = vst [vmem:[%s1219_s9 + $0x8] sm:$0xff] %v1007_v47  ;;  %1028 = vrcp.f32 %v530_v45 }
 0x14c   : > { %v1011_v52 = vpop.eup %1010  ;;  %575 = vst [vmem:[%s1219_s9 + $0x48] sm:$0xff] %v1009_v50  ;;  %1030 = vrcp.f32 %v525_v48 }
 0x14d   : > { %v1013_v53 = vpop.eup %1012  ;;  %566 = vst [vmem:[%s1219_s9] sm:$0xff] %v1011_v52  ;;  %1032 = vpow2.f32 %v516_v46 }
 0x14e   : > { %v1015_v54 = vpop.eup %1014  ;;  %574 = vst [vmem:[%s1219_s9 + $0x40] sm:$0xff] %v1013_v53  ;;  %1034 = vpow2.f32 %v498_v49 }
 0x14f   : > { %v1017_v55 = vpop.eup %1016  ;;  %569 = vst [vmem:[%s1219_s9 + $0x18] sm:$0xff] %v1015_v54  ;;  %1036 = vpow2.f32 %v514_v51 }
 0x150   : > { %v1019_v56 = vpop.eup %1018  ;;  %577 = vst [vmem:[%s1219_s9 + $0x58] sm:$0xff] %v1017_v55 }
 0x151   : > { %v1021_v57 = vpop.eup %1020  ;;  %568 = vst [vmem:[%s1219_s9 + $0x10] sm:$0xff] %v1019_v56 }
 0x152   : > { %v1023_v58 = vpop.eup %1022  ;;  %576 = vst [vmem:[%s1219_s9 + $0x50] sm:$0xff] %v1021_v57  ;;  %v653_v9 = vld [vmem:[%s1219_s9 + $0x8] sm:$0xff] (%p1161_p5) }
 0x153   : > { %v1025_v59 = vpop.eup %1024  ;;  %571 = vst [vmem:[%s1219_s9 + $0x28] sm:$0xff] %v1023_v58  ;;  %v669_v17 = vld [vmem:[%s1219_s9 + $0x48] sm:$0xff] (%p1161_p5)  ;;  %654 = vst [vmem:[%s593_s23 + $0x10] sm:$0xff] (%p1161_p5), %v653_v9 }
 0x154   : > { %v1027_v60 = vpop.eup %1026  ;;  %579 = vst [vmem:[%s1219_s9 + $0x68] sm:$0xff] %v1025_v59  ;;  %v651_v8 = vld [vmem:[%s1219_s9] sm:$0xff] (%p1161_p5)  ;;  %670 = vst [vmem:[%s593_s23 + $0x90] sm:$0xff] (%p1161_p5), %v669_v17 }
 0x155   : > { %v1029_v61 = vpop.eup %1028  ;;  %570 = vst [vmem:[%s1219_s9 + $0x20] sm:$0xff] %v1027_v60  ;;  %v667_v16 = vld [vmem:[%s1219_s9 + $0x40] sm:$0xff] (%p1161_p5)  ;;  %652 = vst [vmem:[%s593_s23] sm:$0xff] (%p1161_p5), %v651_v8 }
 0x156   : > { %v1031_v62 = vpop.eup %1030  ;;  %578 = vst [vmem:[%s1219_s9 + $0x60] sm:$0xff] %v1029_v61  ;;  %v657_v11 = vld [vmem:[%s1219_s9 + $0x18] sm:$0xff] (%p1161_p5)  ;;  %668 = vst [vmem:[%s593_s23 + $0x80] sm:$0xff] (%p1161_p5), %v667_v16 }
 0x157   : > { %v1033_v63 = vpop.eup %1032  ;;  %573 = vst [vmem:[%s1219_s9 + $0x38] sm:$0xff] %v1031_v62  ;;  %v673_v19 = vld [vmem:[%s1219_s9 + $0x58] sm:$0xff] (%p1161_p5)  ;;  %658 = vst [vmem:[%s593_s23 + $0x30] sm:$0xff] (%p1161_p5), %v657_v11 }
 0x158   : > { %v1035_v0 = vpop.eup %1034  ;;  %v533_v1 = vadd.f32 1.0, %v1033_v63  ;;  %v655_v10 = vld [vmem:[%s1219_s9 + $0x10] sm:$0xff] (%p1161_p5)  ;;  %674 = vst [vmem:[%s593_s23 + $0xb0] sm:$0xff] (%p1161_p5), %v673_v19 }
 0x159   : > { %v1037_v2 = vpop.eup %1036  ;;  %v524_v3 = vadd.f32 1.0, %v1035_v0  ;;  %v671_v18 = vld [vmem:[%s1219_s9 + $0x50] sm:$0xff] (%p1161_p5)  ;;  %656 = vst [vmem:[%s593_s23 + $0x20] sm:$0xff] (%p1161_p5), %v655_v10 }
 0x15a   : > { %1038 = vrcp.f32 %v533_v1  ;;  %v532_v4 = vadd.f32 1.0, %v1037_v2  ;;  %v661_v13 = vld [vmem:[%s1219_s9 + $0x28] sm:$0xff] (%p1161_p5)  ;;  %672 = vst [vmem:[%s593_s23 + $0xa0] sm:$0xff] (%p1161_p5), %v671_v18 }
 0x15b   : > { %1040 = vrcp.f32 %v524_v3  ;;  %662 = vst [vmem:[%s593_s23 + $0x50] sm:$0xff] (%p1161_p5), %v661_v13  ;;  %v677_v21 = vld [vmem:[%s1219_s9 + $0x68] sm:$0xff] (%p1161_p5) }
 0x15c   : > { %1042 = vrcp.f32 %v532_v4  ;;  %v659_v12 = vld [vmem:[%s1219_s9 + $0x20] sm:$0xff] (%p1161_p5)  ;;  %678 = vst [vmem:[%s593_s23 + $0xd0] sm:$0xff] (%p1161_p5), %v677_v21 }
 0x15d   : > { %660 = vst [vmem:[%s593_s23 + $0x40] sm:$0xff] (%p1161_p5), %v659_v12  ;;  %v675_v20 = vld [vmem:[%s1219_s9 + $0x60] sm:$0xff] (%p1161_p5) }
 0x15e   : > { %v665_v15 = vld [vmem:[%s1219_s9 + $0x38] sm:$0xff] (%p1161_p5)  ;;  %676 = vst [vmem:[%s593_s23 + $0xc0] sm:$0xff] (%p1161_p5), %v675_v20 }
 0x15f   : > { %666 = vst [vmem:[%s593_s23 + $0x70] sm:$0xff] (%p1161_p5), %v665_v15 }
 0x161   : > { %588 = sbr.rel (!%p1161_p5) target bundleno = 368 (0x170), region = 40 }
 0x164   : > { %v1039_v5 = vpop.eup %1038 }
 0x165   : > { %v1041_v6 = vpop.eup %1040  ;;  %581 = vst [vmem:[%s1219_s9 + $0x78] sm:$0xff] %v1039_v5 }
 0x166   : > { %v1043_v7 = vpop.eup %1042  ;;  %572 = vst [vmem:[%s1219_s9 + $0x30] sm:$0xff] %v1041_v6 }
 0x167   : > { %580 = vst [vmem:[%s1219_s9 + $0x70] sm:$0xff] %v1043_v7 }
 0x16c   : > { %v681_v23 = vld [vmem:[%s1219_s9 + $0x78] sm:$0xff] }
 0x16d   : > { %v663_v14 = vld [vmem:[%s1219_s9 + $0x30] sm:$0xff]  ;;  %682 = vst [vmem:[%s593_s23 + $0xf0] sm:$0xff] %v681_v23 }
 0x16e   : > { %664 = vst [vmem:[%s593_s23 + $0x60] sm:$0xff] %v663_v14  ;;  %v679_v22 = vld [vmem:[%s1219_s9 + $0x70] sm:$0xff] }
 0x16f   : > { %680 = vst [vmem:[%s593_s23 + $0xe0] sm:$0xff] %v679_v22 }
 0x170 PF: > { %s12_s15 = sadd.s32 1, %s1098_s15   ;;  %s1285_s9 = smov %s1078_s10 }
 0x171   : > { %p9_p11 = scmp.ge.s32.totalorder %s12_s15, 6   ;;  %s1286_s10 = smov %s1172_s24 }
 0x172   : > { %s1287_s11 = smov %s1090_s13  ;;  %s1288_s12 = smov %s1094_s14 }
 0x173   : > { %s1289_s13 = smov %s1292_s16  ;;  %s1290_s14 = smov %s1296_s17 }
 0x174   :  { %11 = sbr.rel (!%p9_p11) target bundleno = 4 (0x4), region = 107 }

</bundles_post_ra>
